<compile_context>
chip_gen: v5e
topology: v5e:2x2
jax: 0.10.0
libtpu: 0.0.40
codegen_flags: <defaults>
</compile_context>

<pallas_src>
import jax
import jax.numpy as jnp
from jax import lax
from jax.experimental import pallas as pl
from jax.experimental.pallas import tpu as pltpu

LN_EPS = 1e-5  # PyTorch nn.LayerNorm default


def _round_up(x, m):
    return (x + m - 1) // m * m


def _make_fusion_gate_kernel(e_dim, e_pad):
    need_mask = (e_pad != e_dim)
    inv_e = 1.0 / float(e_dim)

    def kernel(s_ref, h_ref, w_s_ref, w_h_ref, b_ref, gamma_ref, beta_ref, o_ref):
        rows = s_ref.shape[0]

        # MXU matmuls in the operands' native dtype, f32 accumulation.
        sw = jnp.dot(s_ref[...], w_s_ref[...], preferred_element_type=jnp.float32)
        hw = jnp.dot(h_ref[...], w_h_ref[...], preferred_element_type=jnp.float32)

        # Hoist the (1, e) -> (rows, e) broadcasts so they happen once, not
        # once per layer_norm call (JAX does not CSE broadcast_in_dim).
        gamma = jnp.broadcast_to(gamma_ref[...].astype(jnp.float32), (rows, e_pad))
        beta = jnp.broadcast_to(beta_ref[...].astype(jnp.float32), (rows, e_pad))
        bias = b_ref[...].astype(jnp.float32)

        if need_mask:
            col = lax.broadcasted_iota(jnp.int32, (1, e_pad), 1)
            mask = (col < e_dim).astype(jnp.float32)
        else:
            mask = None

        def layer_norm(x):
            # Padded lanes of x are guaranteed zero by the wrapper padding, so
            # the sums only see real columns; divide by the true e_dim.
            mu = jnp.sum(x, axis=-1, keepdims=True) * inv_e
            d = x - mu
            dm = d * mask if mask is not None else d
            var = jnp.sum(dm * dm, axis=-1, keepdims=True) * inv_e
            return d * lax.rsqrt(var + LN_EPS) * gamma + beta

        s_f = layer_norm(sw)
        h_f = layer_norm(hw)

        # TODO(synk): nn.Dropout is identity at inference; training-mode dropout
        # (pltpu.prng_random_bits mask) is not implemented here.
        f = jax.nn.sigmoid(s_f + h_f + bias)

        outs = h_f + f * (s_f - h_f)   # == f*s_f + (1-f)*h_f, one fewer mul
        o_ref[...] = layer_norm(outs).astype(o_ref.dtype)

    return kernel


def fusion_gate(s, h, w_s, w_h, b, gamma, beta, *, tm=512, vmem_limit_bytes=None):
    """s, h: (batch, seq, e_dim). Returns (batch, seq, e_dim)."""
    orig_shape = s.shape
    e_dim = orig_shape[-1]
    out_dtype = s.dtype

    s2 = s.reshape(-1, e_dim)
    h2 = h.reshape(-1, e_dim)
    M = s2.shape[0]

    # Lane-dense last dim; row tile is a multiple of 8, capped by problem size.
    e_pad = _round_up(e_dim, 128)
    m8 = _round_up(max(M, 1), 8)
    tm_eff = m8 if m8 <= tm else tm
    M_pad = _round_up(M, tm_eff)

    pad_m = M_pad - M
    pad_e = e_pad - e_dim
    if pad_m or pad_e:
        s2 = jnp.pad(s2, ((0, pad_m), (0, pad_e)))
        h2 = jnp.pad(h2, ((0, pad_m), (0, pad_e)))
    if pad_e:
        w_s = jnp.pad(w_s, ((0, pad_e), (0, pad_e)))
        w_h = jnp.pad(w_h, ((0, pad_e), (0, pad_e)))
        b = jnp.pad(b, (0, pad_e))
        gamma = jnp.pad(gamma, (0, pad_e))
        beta = jnp.pad(beta, (0, pad_e))

    b2 = b.reshape(1, e_pad)
    gamma2 = gamma.reshape(1, e_pad)
    beta2 = beta.reshape(1, e_pad)

    in_sz = jnp.dtype(s.dtype).itemsize
    w_sz = jnp.dtype(w_s.dtype).itemsize

    # VMEM: s, h, out row tiles double-buffered + weights/vecs single-buffered.
    need = (3 * 2 * tm_eff * e_pad * in_sz
            + 2 * e_pad * e_pad * w_sz
            + 3 * e_pad * 4)
    if vmem_limit_bytes is None:
        vmem_limit_bytes = min(max(2 * need + (8 << 20), 32 << 20), 100 << 20)

    cost = pl.CostEstimate(
        flops=int(4 * M_pad * e_pad * e_pad),          # two matmuls
        transcendentals=int(M_pad * e_pad),            # sigmoid
        bytes_accessed=int(3 * M_pad * e_pad * in_sz
                           + 2 * e_pad * e_pad * w_sz
                           + 3 * e_pad * 4),
    )

    kernel = _make_fusion_gate_kernel(e_dim, e_pad)

    def run(single_buffer_invariants):
        inv_kwargs = (dict(pipeline_mode=pl.Buffered(1))
                      if single_buffer_invariants else {})
        row_spec = pl.BlockSpec((tm_eff, e_pad), lambda i: (i, 0))
        w_spec = pl.BlockSpec((e_pad, e_pad), lambda i: (0, 0), **inv_kwargs)
        vec_spec = pl.BlockSpec((1, e_pad), lambda i: (0, 0), **inv_kwargs)
        return pl.pallas_call(
            kernel,
            out_shape=jax.ShapeDtypeStruct((M_pad, e_pad), out_dtype),
            grid_spec=pltpu.PrefetchScalarGridSpec(
                num_scalar_prefetch=0,
                grid=(M_pad // tm_eff,),
                in_specs=[row_spec, row_spec, w_spec, w_spec,
                          vec_spec, vec_spec, vec_spec],
                out_specs=row_spec,
            ),
            compiler_params=pltpu.CompilerParams(
                dimension_semantics=("parallel",),
                vmem_limit_bytes=int(vmem_limit_bytes),
            ),
            cost_estimate=cost,
        )(s2, h2, w_s, w_h, b2, gamma2, beta2)

    try:
        out = run(single_buffer_invariants=True)
    except Exception:
        # Fallback for jax versions without BlockSpec(pipeline_mode=pl.Buffered(1));
        # identical semantics, weights just get the default double-buffering.
        out = run(single_buffer_invariants=False)

    if pad_m or pad_e:
        out = out[:M, :e_dim]
    return out.reshape(orig_shape)


def init_params(key, e_dim):
    # xavier_normal_: std = sqrt(2 / (fan_in + fan_out)) = 1/sqrt(e_dim)
    k1, k2 = jax.random.split(key)
    std = (2.0 / (e_dim + e_dim)) ** 0.5
    w_s = jax.random.normal(k1, (e_dim, e_dim), jnp.float32) * std
    w_h = jax.random.normal(k2, (e_dim, e_dim), jnp.float32) * std
    b = jnp.zeros((e_dim,), jnp.float32)
    gamma = jnp.ones((e_dim,), jnp.float32)   # LayerNorm weight
    beta = jnp.zeros((e_dim,), jnp.float32)   # LayerNorm bias
    return w_s, w_h, b, gamma, beta


def fusion_gate_ref(s, h, w_s, w_h, b, gamma, beta):
    def ln(x):
        mu = jnp.mean(x, axis=-1, keepdims=True)
        var = jnp.mean(jnp.square(x - mu), axis=-1, keepdims=True)
        return (x - mu) * lax.rsqrt(var + LN_EPS) * gamma + beta
    s_f = ln(s @ w_s)
    h_f = ln(h @ w_h)
    f = jax.nn.sigmoid(s_f + h_f + b)
    return ln(f * s_f + (1.0 - f) * h_f)


if __name__ == "__main__":
    key = jax.random.PRNGKey(0)

    # Case 1: lane-dense e_dim (multiple of 128) -> fast path, no padding.
    # Case 2: e_dim=32 -> exercises the lane-padding + masked-LayerNorm path.
    for batch, seq, e_dim in [(2, 8, 128), (2, 8, 32)]:
        k = jax.random.fold_in(key, e_dim)
        ks, kh, kp = jax.random.split(k, 3)

        s = jax.random.normal(ks, (batch, seq, e_dim), jnp.float32)
        h = jax.random.normal(kh, (batch, seq, e_dim), jnp.float32)
        w_s, w_h, b, gamma, beta = init_params(kp, e_dim)

        out = fusion_gate(s, h, w_s, w_h, b, gamma, beta)
        out = jax.block_until_ready(out)

        ref = fusion_gate_ref(s, h, w_s, w_h, b, gamma, beta)
        assert out.shape == (batch, seq, e_dim)
        assert jnp.allclose(out, ref, atol=1e-4, rtol=1e-4), \
            f"mismatch vs reference at e_dim={e_dim}"

    print("KERNEL_OK")
</pallas_src>

<mosaic_0001>
module attributes {stable_mosaic.version = 11 : i64} {
  func.func @kernel(%arg0: i32, %arg1: memref<16x128xf32, #tpu.memory_space<vmem>>, %arg2: memref<16x128xf32, #tpu.memory_space<vmem>>, %arg3: memref<128x128xf32, #tpu.memory_space<vmem>>, %arg4: memref<128x128xf32, #tpu.memory_space<vmem>>, %arg5: memref<1x128xf32, #tpu.memory_space<vmem>>, %arg6: memref<1x128xf32, #tpu.memory_space<vmem>>, %arg7: memref<1x128xf32, #tpu.memory_space<vmem>>, %arg8: memref<16x128xf32, #tpu.memory_space<vmem>>) attributes {dimension_semantics = [#tpu.dimension_semantics<parallel>], iteration_bounds = array<i64: 1>, scalar_prefetch = 0 : i64, scratch_operands = 0 : i64, tpu.core_type = #tpu.core_type<tc>, window_params = [{transform_indices = @transform_0, window_bounds = array<i64: 16, 128>}, {transform_indices = @transform_1, window_bounds = array<i64: 16, 128>}, {pipeline_mode = #tpu.pipeline_mode<synchronous>, transform_indices = @transform_2, window_bounds = array<i64: 128, 128>}, {pipeline_mode = #tpu.pipeline_mode<synchronous>, transform_indices = @transform_3, window_bounds = array<i64: 128, 128>}, {pipeline_mode = #tpu.pipeline_mode<synchronous>, transform_indices = @transform_4, window_bounds = array<i64: 1, 128>}, {pipeline_mode = #tpu.pipeline_mode<synchronous>, transform_indices = @transform_5, window_bounds = array<i64: 1, 128>}, {pipeline_mode = #tpu.pipeline_mode<synchronous>, transform_indices = @transform_6, window_bounds = array<i64: 1, 128>}, {transform_indices = @transform_7, window_bounds = array<i64: 16, 128>}]} {
    %c0 = arith.constant 0 : index
    %c0_0 = arith.constant 0 : index
    %0 = vector.load %arg1[%c0, %c0_0] : memref<16x128xf32, #tpu.memory_space<vmem>>, vector<16x128xf32>
    %c0_1 = arith.constant 0 : index
    %c0_2 = arith.constant 0 : index
    %1 = vector.load %arg3[%c0_1, %c0_2] : memref<128x128xf32, #tpu.memory_space<vmem>>, vector<128x128xf32>
    %cst = arith.constant dense<0.000000e+00> : vector<16x128xf32>
    %2 = tpu.matmul %0, %1, %cst {dimension_numbers = #tpu.dot_dimension_numbers<[1], [0], [0], [1], [0, 0, 1, 1], [], []>} : vector<16x128xf32>, vector<128x128xf32>, vector<16x128xf32> -> vector<16x128xf32>
    %c0_3 = arith.constant 0 : index
    %c0_4 = arith.constant 0 : index
    %3 = vector.load %arg2[%c0_3, %c0_4] : memref<16x128xf32, #tpu.memory_space<vmem>>, vector<16x128xf32>
    %c0_5 = arith.constant 0 : index
    %c0_6 = arith.constant 0 : index
    %4 = vector.load %arg4[%c0_5, %c0_6] : memref<128x128xf32, #tpu.memory_space<vmem>>, vector<128x128xf32>
    %cst_7 = arith.constant dense<0.000000e+00> : vector<16x128xf32>
    %5 = tpu.matmul %3, %4, %cst_7 {dimension_numbers = #tpu.dot_dimension_numbers<[1], [0], [0], [1], [0, 0, 1, 1], [], []>} : vector<16x128xf32>, vector<128x128xf32>, vector<16x128xf32> -> vector<16x128xf32>
    %c0_8 = arith.constant 0 : index
    %c0_9 = arith.constant 0 : index
    %6 = vector.load %arg6[%c0_8, %c0_9] : memref<1x128xf32, #tpu.memory_space<vmem>>, vector<1x128xf32>
    %7 = vector.shape_cast %6 : vector<1x128xf32> to vector<1x128xf32>
    %8 = vector.broadcast %7 : vector<1x128xf32> to vector<16x128xf32>
    %c0_10 = arith.constant 0 : index
    %c0_11 = arith.constant 0 : index
    %9 = vector.load %arg7[%c0_10, %c0_11] : memref<1x128xf32, #tpu.memory_space<vmem>>, vector<1x128xf32>
    %10 = vector.shape_cast %9 : vector<1x128xf32> to vector<1x128xf32>
    %11 = vector.broadcast %10 : vector<1x128xf32> to vector<16x128xf32>
    %c0_12 = arith.constant 0 : index
    %c0_13 = arith.constant 0 : index
    %12 = vector.load %arg5[%c0_12, %c0_13] : memref<1x128xf32, #tpu.memory_space<vmem>>, vector<1x128xf32>
    %cst_14 = arith.constant dense<0.000000e+00> : vector<16xf32>
    %13 = vector.multi_reduction <add>, %2, %cst_14 [1] : vector<16x128xf32> to vector<16xf32>
    %14 = vector.shape_cast %13 : vector<16xf32> to vector<16x1xf32>
    %cst_15 = arith.constant 7.812500e-03 : f32
    %15 = vector.broadcast %cst_15 : f32 to vector<16x1xf32>
    %16 = arith.mulf %14, %15 : vector<16x1xf32>
    %17 = vector.broadcast %16 : vector<16x1xf32> to vector<16x128xf32>
    %18 = arith.subf %2, %17 : vector<16x128xf32>
    %19 = arith.mulf %18, %18 : vector<16x128xf32>
    %cst_16 = arith.constant dense<0.000000e+00> : vector<16xf32>
    %20 = vector.multi_reduction <add>, %19, %cst_16 [1] : vector<16x128xf32> to vector<16xf32>
    %21 = vector.shape_cast %20 : vector<16xf32> to vector<16x1xf32>
    %cst_17 = arith.constant 7.812500e-03 : f32
    %22 = vector.broadcast %cst_17 : f32 to vector<16x1xf32>
    %23 = arith.mulf %21, %22 : vector<16x1xf32>
    %cst_18 = arith.constant 9.99999974E-6 : f32
    %24 = vector.broadcast %cst_18 : f32 to vector<16x1xf32>
    %25 = arith.addf %23, %24 : vector<16x1xf32>
    %26 = math.rsqrt %25 : vector<16x1xf32>
    %27 = vector.broadcast %26 : vector<16x1xf32> to vector<16x128xf32>
    %28 = arith.mulf %18, %27 : vector<16x128xf32>
    %29 = arith.mulf %28, %8 : vector<16x128xf32>
    %30 = arith.addf %29, %11 : vector<16x128xf32>
    %cst_19 = arith.constant dense<0.000000e+00> : vector<16xf32>
    %31 = vector.multi_reduction <add>, %5, %cst_19 [1] : vector<16x128xf32> to vector<16xf32>
    %32 = vector.shape_cast %31 : vector<16xf32> to vector<16x1xf32>
    %cst_20 = arith.constant 7.812500e-03 : f32
    %33 = vector.broadcast %cst_20 : f32 to vector<16x1xf32>
    %34 = arith.mulf %32, %33 : vector<16x1xf32>
    %35 = vector.broadcast %34 : vector<16x1xf32> to vector<16x128xf32>
    %36 = arith.subf %5, %35 : vector<16x128xf32>
    %37 = arith.mulf %36, %36 : vector<16x128xf32>
    %cst_21 = arith.constant dense<0.000000e+00> : vector<16xf32>
    %38 = vector.multi_reduction <add>, %37, %cst_21 [1] : vector<16x128xf32> to vector<16xf32>
    %39 = vector.shape_cast %38 : vector<16xf32> to vector<16x1xf32>
    %cst_22 = arith.constant 7.812500e-03 : f32
    %40 = vector.broadcast %cst_22 : f32 to vector<16x1xf32>
    %41 = arith.mulf %39, %40 : vector<16x1xf32>
    %cst_23 = arith.constant 9.99999974E-6 : f32
    %42 = vector.broadcast %cst_23 : f32 to vector<16x1xf32>
    %43 = arith.addf %41, %42 : vector<16x1xf32>
    %44 = math.rsqrt %43 : vector<16x1xf32>
    %45 = vector.broadcast %44 : vector<16x1xf32> to vector<16x128xf32>
    %46 = arith.mulf %36, %45 : vector<16x128xf32>
    %47 = arith.mulf %46, %8 : vector<16x128xf32>
    %48 = arith.addf %47, %11 : vector<16x128xf32>
    %49 = arith.addf %30, %48 : vector<16x128xf32>
    %50 = vector.broadcast %12 : vector<1x128xf32> to vector<16x128xf32>
    %51 = arith.addf %49, %50 : vector<16x128xf32>
    %52 = arith.negf %51 : vector<16x128xf32>
    %53 = math.exp %52 : vector<16x128xf32>
    %cst_24 = arith.constant 1.000000e+00 : f32
    %54 = vector.broadcast %cst_24 : f32 to vector<16x128xf32>
    %55 = arith.addf %54, %53 : vector<16x128xf32>
    %56 = arith.divf %54, %55 : vector<16x128xf32>
    %57 = arith.subf %30, %48 : vector<16x128xf32>
    %58 = arith.mulf %56, %57 : vector<16x128xf32>
    %59 = arith.addf %48, %58 : vector<16x128xf32>
    %cst_25 = arith.constant dense<0.000000e+00> : vector<16xf32>
    %60 = vector.multi_reduction <add>, %59, %cst_25 [1] : vector<16x128xf32> to vector<16xf32>
    %61 = vector.shape_cast %60 : vector<16xf32> to vector<16x1xf32>
    %cst_26 = arith.constant 7.812500e-03 : f32
    %62 = vector.broadcast %cst_26 : f32 to vector<16x1xf32>
    %63 = arith.mulf %61, %62 : vector<16x1xf32>
    %64 = vector.broadcast %63 : vector<16x1xf32> to vector<16x128xf32>
    %65 = arith.subf %59, %64 : vector<16x128xf32>
    %66 = arith.mulf %65, %65 : vector<16x128xf32>
    %cst_27 = arith.constant dense<0.000000e+00> : vector<16xf32>
    %67 = vector.multi_reduction <add>, %66, %cst_27 [1] : vector<16x128xf32> to vector<16xf32>
    %68 = vector.shape_cast %67 : vector<16xf32> to vector<16x1xf32>
    %cst_28 = arith.constant 7.812500e-03 : f32
    %69 = vector.broadcast %cst_28 : f32 to vector<16x1xf32>
    %70 = arith.mulf %68, %69 : vector<16x1xf32>
    %cst_29 = arith.constant 9.99999974E-6 : f32
    %71 = vector.broadcast %cst_29 : f32 to vector<16x1xf32>
    %72 = arith.addf %70, %71 : vector<16x1xf32>
    %73 = math.rsqrt %72 : vector<16x1xf32>
    %74 = vector.broadcast %73 : vector<16x1xf32> to vector<16x128xf32>
    %75 = arith.mulf %65, %74 : vector<16x128xf32>
    %76 = arith.mulf %75, %8 : vector<16x128xf32>
    %77 = arith.addf %76, %11 : vector<16x128xf32>
    %c0_30 = arith.constant 0 : index
    %c0_31 = arith.constant 0 : index
    %78 = vector.load %arg8[%c0_30, %c0_31] : memref<16x128xf32, #tpu.memory_space<vmem>>, vector<16x128xf32>
    tpu.vector_store %arg8[%c0_30, %c0_31], %77 {strides = array<i32>} : memref<16x128xf32, #tpu.memory_space<vmem>>, vector<16x128xf32>,
    return
  }
  func.func @transform_0(%arg0: i32) -> (i32, i32) {
    %c0_i32 = arith.constant 0 : i32
    %c0_i32_0 = arith.constant 0 : i32
    return %arg0, %c0_i32 : i32, i32
  }
  func.func @transform_1(%arg0: i32) -> (i32, i32) {
    %c0_i32 = arith.constant 0 : i32
    %c0_i32_0 = arith.constant 0 : i32
    return %arg0, %c0_i32 : i32, i32
  }
  func.func @transform_2(%arg0: i32) -> (i32, i32) {
    %c0_i32 = arith.constant 0 : i32
    %c0_i32_0 = arith.constant 0 : i32
    %c0_i32_1 = arith.constant 0 : i32
    return %c0_i32, %c0_i32_0 : i32, i32
  }
  func.func @transform_3(%arg0: i32) -> (i32, i32) {
    %c0_i32 = arith.constant 0 : i32
    %c0_i32_0 = arith.constant 0 : i32
    %c0_i32_1 = arith.constant 0 : i32
    return %c0_i32, %c0_i32_0 : i32, i32
  }
  func.func @transform_4(%arg0: i32) -> (i32, i32) {
    %c0_i32 = arith.constant 0 : i32
    %c0_i32_0 = arith.constant 0 : i32
    %c0_i32_1 = arith.constant 0 : i32
    return %c0_i32, %c0_i32_0 : i32, i32
  }
  func.func @transform_5(%arg0: i32) -> (i32, i32) {
    %c0_i32 = arith.constant 0 : i32
    %c0_i32_0 = arith.constant 0 : i32
    %c0_i32_1 = arith.constant 0 : i32
    return %c0_i32, %c0_i32_0 : i32, i32
  }
  func.func @transform_6(%arg0: i32) -> (i32, i32) {
    %c0_i32 = arith.constant 0 : i32
    %c0_i32_0 = arith.constant 0 : i32
    %c0_i32_1 = arith.constant 0 : i32
    return %c0_i32, %c0_i32_0 : i32, i32
  }
  func.func @transform_7(%arg0: i32) -> (i32, i32) {
    %c0_i32 = arith.constant 0 : i32
    %c0_i32_0 = arith.constant 0 : i32
    return %arg0, %c0_i32 : i32, i32
  }
}

module attributes {stable_mosaic.version = 11 : i64} {
  func.func @kernel(%arg0: i32, %arg1: memref<16x128xf32, #tpu.memory_space<vmem>>, %arg2: memref<16x128xf32, #tpu.memory_space<vmem>>, %arg3: memref<128x128xf32, #tpu.memory_space<vmem>>, %arg4: memref<128x128xf32, #tpu.memory_space<vmem>>, %arg5: memref<1x128xf32, #tpu.memory_space<vmem>>, %arg6: memref<1x128xf32, #tpu.memory_space<vmem>>, %arg7: memref<1x128xf32, #tpu.memory_space<vmem>>, %arg8: memref<16x128xf32, #tpu.memory_space<vmem>>) attributes {dimension_semantics = [#tpu.dimension_semantics<parallel>], iteration_bounds = array<i64: 1>, scalar_prefetch = 0 : i64, scratch_operands = 0 : i64, tpu.core_type = #tpu.core_type<tc>, window_params = [{transform_indices = @transform_0, window_bounds = array<i64: 16, 128>}, {transform_indices = @transform_1, window_bounds = array<i64: 16, 128>}, {pipeline_mode = #tpu.pipeline_mode<synchronous>, transform_indices = @transform_2, window_bounds = array<i64: 128, 128>}, {pipeline_mode = #tpu.pipeline_mode<synchronous>, transform_indices = @transform_3, window_bounds = array<i64: 128, 128>}, {pipeline_mode = #tpu.pipeline_mode<synchronous>, transform_indices = @transform_4, window_bounds = array<i64: 1, 128>}, {pipeline_mode = #tpu.pipeline_mode<synchronous>, transform_indices = @transform_5, window_bounds = array<i64: 1, 128>}, {pipeline_mode = #tpu.pipeline_mode<synchronous>, transform_indices = @transform_6, window_bounds = array<i64: 1, 128>}, {transform_indices = @transform_7, window_bounds = array<i64: 16, 128>}]} {
    %c0 = arith.constant 0 : index
    %c0_0 = arith.constant 0 : index
    %0 = vector.load %arg1[%c0, %c0_0] : memref<16x128xf32, #tpu.memory_space<vmem>>, vector<16x128xf32>
    %c0_1 = arith.constant 0 : index
    %c0_2 = arith.constant 0 : index
    %1 = vector.load %arg3[%c0_1, %c0_2] : memref<128x128xf32, #tpu.memory_space<vmem>>, vector<128x128xf32>
    %cst = arith.constant dense<0.000000e+00> : vector<16x128xf32>
    %2 = tpu.matmul %0, %1, %cst {dimension_numbers = #tpu.dot_dimension_numbers<[1], [0], [0], [1], [0, 0, 1, 1], [], []>} : vector<16x128xf32>, vector<128x128xf32>, vector<16x128xf32> -> vector<16x128xf32>
    %c0_3 = arith.constant 0 : index
    %c0_4 = arith.constant 0 : index
    %3 = vector.load %arg2[%c0_3, %c0_4] : memref<16x128xf32, #tpu.memory_space<vmem>>, vector<16x128xf32>
    %c0_5 = arith.constant 0 : index
    %c0_6 = arith.constant 0 : index
    %4 = vector.load %arg4[%c0_5, %c0_6] : memref<128x128xf32, #tpu.memory_space<vmem>>, vector<128x128xf32>
    %cst_7 = arith.constant dense<0.000000e+00> : vector<16x128xf32>
    %5 = tpu.matmul %3, %4, %cst_7 {dimension_numbers = #tpu.dot_dimension_numbers<[1], [0], [0], [1], [0, 0, 1, 1], [], []>} : vector<16x128xf32>, vector<128x128xf32>, vector<16x128xf32> -> vector<16x128xf32>
    %c0_8 = arith.constant 0 : index
    %c0_9 = arith.constant 0 : index
    %6 = vector.load %arg6[%c0_8, %c0_9] : memref<1x128xf32, #tpu.memory_space<vmem>>, vector<1x128xf32>
    %7 = vector.shape_cast %6 : vector<1x128xf32> to vector<1x128xf32>
    %8 = vector.broadcast %7 : vector<1x128xf32> to vector<16x128xf32>
    %c0_10 = arith.constant 0 : index
    %c0_11 = arith.constant 0 : index
    %9 = vector.load %arg7[%c0_10, %c0_11] : memref<1x128xf32, #tpu.memory_space<vmem>>, vector<1x128xf32>
    %10 = vector.shape_cast %9 : vector<1x128xf32> to vector<1x128xf32>
    %11 = vector.broadcast %10 : vector<1x128xf32> to vector<16x128xf32>
    %c0_12 = arith.constant 0 : index
    %c0_13 = arith.constant 0 : index
    %12 = vector.load %arg5[%c0_12, %c0_13] : memref<1x128xf32, #tpu.memory_space<vmem>>, vector<1x128xf32>
    %cst_14 = arith.constant dense<0.000000e+00> : vector<16xf32>
    %13 = vector.multi_reduction <add>, %2, %cst_14 [1] : vector<16x128xf32> to vector<16xf32>
    %14 = vector.shape_cast %13 : vector<16xf32> to vector<16x1xf32>
    %cst_15 = arith.constant 7.812500e-03 : f32
    %15 = vector.broadcast %cst_15 : f32 to vector<16x1xf32>
    %16 = arith.mulf %14, %15 : vector<16x1xf32>
    %17 = vector.broadcast %16 : vector<16x1xf32> to vector<16x128xf32>
    %18 = arith.subf %2, %17 : vector<16x128xf32>
    %19 = arith.mulf %18, %18 : vector<16x128xf32>
    %cst_16 = arith.constant dense<0.000000e+00> : vector<16xf32>
    %20 = vector.multi_reduction <add>, %19, %cst_16 [1] : vector<16x128xf32> to vector<16xf32>
    %21 = vector.shape_cast %20 : vector<16xf32> to vector<16x1xf32>
    %cst_17 = arith.constant 7.812500e-03 : f32
    %22 = vector.broadcast %cst_17 : f32 to vector<16x1xf32>
    %23 = arith.mulf %21, %22 : vector<16x1xf32>
    %cst_18 = arith.constant 9.99999974E-6 : f32
    %24 = vector.broadcast %cst_18 : f32 to vector<16x1xf32>
    %25 = arith.addf %23, %24 : vector<16x1xf32>
    %26 = math.rsqrt %25 : vector<16x1xf32>
    %27 = vector.broadcast %26 : vector<16x1xf32> to vector<16x128xf32>
    %28 = arith.mulf %18, %27 : vector<16x128xf32>
    %29 = arith.mulf %28, %8 : vector<16x128xf32>
    %30 = arith.addf %29, %11 : vector<16x128xf32>
    %cst_19 = arith.constant dense<0.000000e+00> : vector<16xf32>
    %31 = vector.multi_reduction <add>, %5, %cst_19 [1] : vector<16x128xf32> to vector<16xf32>
    %32 = vector.shape_cast %31 : vector<16xf32> to vector<16x1xf32>
    %cst_20 = arith.constant 7.812500e-03 : f32
    %33 = vector.broadcast %cst_20 : f32 to vector<16x1xf32>
    %34 = arith.mulf %32, %33 : vector<16x1xf32>
    %35 = vector.broadcast %34 : vector<16x1xf32> to vector<16x128xf32>
    %36 = arith.subf %5, %35 : vector<16x128xf32>
    %37 = arith.mulf %36, %36 : vector<16x128xf32>
    %cst_21 = arith.constant dense<0.000000e+00> : vector<16xf32>
    %38 = vector.multi_reduction <add>, %37, %cst_21 [1] : vector<16x128xf32> to vector<16xf32>
    %39 = vector.shape_cast %38 : vector<16xf32> to vector<16x1xf32>
    %cst_22 = arith.constant 7.812500e-03 : f32
    %40 = vector.broadcast %cst_22 : f32 to vector<16x1xf32>
    %41 = arith.mulf %39, %40 : vector<16x1xf32>
    %cst_23 = arith.constant 9.99999974E-6 : f32
    %42 = vector.broadcast %cst_23 : f32 to vector<16x1xf32>
    %43 = arith.addf %41, %42 : vector<16x1xf32>
    %44 = math.rsqrt %43 : vector<16x1xf32>
    %45 = vector.broadcast %44 : vector<16x1xf32> to vector<16x128xf32>
    %46 = arith.mulf %36, %45 : vector<16x128xf32>
    %47 = arith.mulf %46, %8 : vector<16x128xf32>
    %48 = arith.addf %47, %11 : vector<16x128xf32>
    %49 = arith.addf %30, %48 : vector<16x128xf32>
    %50 = vector.broadcast %12 : vector<1x128xf32> to vector<16x128xf32>
    %51 = arith.addf %49, %50 : vector<16x128xf32>
    %52 = arith.negf %51 : vector<16x128xf32>
    %53 = math.exp %52 : vector<16x128xf32>
    %cst_24 = arith.constant 1.000000e+00 : f32
    %54 = vector.broadcast %cst_24 : f32 to vector<16x128xf32>
    %55 = arith.addf %54, %53 : vector<16x128xf32>
    %56 = arith.divf %54, %55 : vector<16x128xf32>
    %57 = arith.subf %30, %48 : vector<16x128xf32>
    %58 = arith.mulf %56, %57 : vector<16x128xf32>
    %59 = arith.addf %48, %58 : vector<16x128xf32>
    %cst_25 = arith.constant dense<0.000000e+00> : vector<16xf32>
    %60 = vector.multi_reduction <add>, %59, %cst_25 [1] : vector<16x128xf32> to vector<16xf32>
    %61 = vector.shape_cast %60 : vector<16xf32> to vector<16x1xf32>
    %cst_26 = arith.constant 7.812500e-03 : f32
    %62 = vector.broadcast %cst_26 : f32 to vector<16x1xf32>
    %63 = arith.mulf %61, %62 : vector<16x1xf32>
    %64 = vector.broadcast %63 : vector<16x1xf32> to vector<16x128xf32>
    %65 = arith.subf %59, %64 : vector<16x128xf32>
    %66 = arith.mulf %65, %65 : vector<16x128xf32>
    %cst_27 = arith.constant dense<0.000000e+00> : vector<16xf32>
    %67 = vector.multi_reduction <add>, %66, %cst_27 [1] : vector<16x128xf32> to vector<16xf32>
    %68 = vector.shape_cast %67 : vector<16xf32> to vector<16x1xf32>
    %cst_28 = arith.constant 7.812500e-03 : f32
    %69 = vector.broadcast %cst_28 : f32 to vector<16x1xf32>
    %70 = arith.mulf %68, %69 : vector<16x1xf32>
    %cst_29 = arith.constant 9.99999974E-6 : f32
    %71 = vector.broadcast %cst_29 : f32 to vector<16x1xf32>
    %72 = arith.addf %70, %71 : vector<16x1xf32>
    %73 = math.rsqrt %72 : vector<16x1xf32>
    %74 = vector.broadcast %73 : vector<16x1xf32> to vector<16x128xf32>
    %75 = arith.mulf %65, %74 : vector<16x128xf32>
    %76 = arith.mulf %75, %8 : vector<16x128xf32>
    %77 = arith.addf %76, %11 : vector<16x128xf32>
    %c0_30 = arith.constant 0 : index
    %c0_31 = arith.constant 0 : index
    %78 = vector.load %arg8[%c0_30, %c0_31] : memref<16x128xf32, #tpu.memory_space<vmem>>, vector<16x128xf32>
    tpu.vector_store %arg8[%c0_30, %c0_31], %77 {strides = array<i32>} : memref<16x128xf32, #tpu.memory_space<vmem>>, vector<16x128xf32>,
    return
  }
  func.func @transform_0(%arg0: i32) -> (i32, i32) {
    %c0_i32 = arith.constant 0 : i32
    %c0_i32_0 = arith.constant 0 : i32
    return %arg0, %c0_i32 : i32, i32
  }
  func.func @transform_1(%arg0: i32) -> (i32, i32) {
    %c0_i32 = arith.constant 0 : i32
    %c0_i32_0 = arith.constant 0 : i32
    return %arg0, %c0_i32 : i32, i32
  }
  func.func @transform_2(%arg0: i32) -> (i32, i32) {
    %c0_i32 = arith.constant 0 : i32
    %c0_i32_0 = arith.constant 0 : i32
    %c0_i32_1 = arith.constant 0 : i32
    return %c0_i32, %c0_i32_0 : i32, i32
  }
  func.func @transform_3(%arg0: i32) -> (i32, i32) {
    %c0_i32 = arith.constant 0 : i32
    %c0_i32_0 = arith.constant 0 : i32
    %c0_i32_1 = arith.constant 0 : i32
    return %c0_i32, %c0_i32_0 : i32, i32
  }
  func.func @transform_4(%arg0: i32) -> (i32, i32) {
    %c0_i32 = arith.constant 0 : i32
    %c0_i32_0 = arith.constant 0 : i32
    %c0_i32_1 = arith.constant 0 : i32
    return %c0_i32, %c0_i32_0 : i32, i32
  }
  func.func @transform_5(%arg0: i32) -> (i32, i32) {
    %c0_i32 = arith.constant 0 : i32
    %c0_i32_0 = arith.constant 0 : i32
    %c0_i32_1 = arith.constant 0 : i32
    return %c0_i32, %c0_i32_0 : i32, i32
  }
  func.func @transform_6(%arg0: i32) -> (i32, i32) {
    %c0_i32 = arith.constant 0 : i32
    %c0_i32_0 = arith.constant 0 : i32
    %c0_i32_1 = arith.constant 0 : i32
    return %c0_i32, %c0_i32_0 : i32, i32
  }
  func.func @transform_7(%arg0: i32) -> (i32, i32) {
    %c0_i32 = arith.constant 0 : i32
    %c0_i32_0 = arith.constant 0 : i32
    return %arg0, %c0_i32 : i32, i32
  }
}

</mosaic_0001>

<bundles_post_ra>
// kernel: tpu_custom_call.1
= control target key start
LH: loop header
LB: loop body
LE: loop exit
PB: predicated region body
PF: predicated region fallthrough
CT: control target
= control target key end

     0   :  { %12 = vsyncpa [#allocation3], 0  ;;  %s691_s0 = inlined_call_operand.hbm [shape: f32[16,128], index: 0, kind: input, shape index: {}]   ;;  %s692_s1 = inlined_call_operand.hbm [shape: f32[16,128], index: 1, kind: input, shape index: {}]   ;;  %s693_s2 = inlined_call_operand.hbm [shape: f32[128,128], index: 2, kind: input, shape index: {}]   ;;  %s694_s3 = inlined_call_operand.hbm [shape: f32[128,128], index: 3, kind: input, shape index: {}]   ;;  %s695_s4 = inlined_call_operand.vmem [shape: f32[1,128], index: 4, kind: input, shape index: {}]   ;;  %s696_s5 = inlined_call_operand.vmem [shape: f32[1,128], index: 5, kind: input, shape index: {}]   ;;  %s697_s6 = inlined_call_operand.vmem [shape: f32[1,128], index: 6, kind: input, shape index: {}]   ;;  %s698_s7 = inlined_call_operand.hbm [shape: f32[16,128], index: 7, kind: output, shape index: {}]  }
   0x1   :  { %13 = vsyncpa [#allocation6], 0 }
   0x2   :  { %14 = vsyncpa [#allocation9], 0 }
   0x3   :  { %15 = vsyncpa [#allocation4], 0  ;;  %s33_s26 = sshll.u32 %s692_s1, 4  ;;  %s579_s27 = smov [#allocation5]   ;;  %s34_s26 = int_to_ptr.hbm [resolvable:$true] %s33_s26 }
   0x4   :  { %s35_s28 = sshll.u32 %s579_s27, 4  ;;  %s20_s8 = sshll.u32 %s691_s0, 4  ;;  %s36_s28 = int_to_ptr.vmem [resolvable:$true] %s35_s28  ;;  %s21_s8 = int_to_ptr.hbm [resolvable:$true] %s20_s8 }
   0x5   :  { %s580_s9 = smov 128   ;;  %s581_s10 = smov 8  }
   0x6   :  { %41 = dma.hbm_to_vmem [thread:$0]  %s34_s26, 256, %s36_s28, [#allocation6], %s580_s9, %s580_s9, %s581_s10  }
   0x7   :  { %s582_s11 = smov [#allocation2]   ;;  %s46_s1 = sshll.u32 %s693_s2, 4  ;;  %s47_s1 = int_to_ptr.hbm [resolvable:$true] %s46_s1 }
   0x8   :  { %s22_s12 = sshll.u32 %s582_s11, 4  ;;  %s59_s16 = sshll.u32 %s694_s3, 4  ;;  %s23_s12 = int_to_ptr.vmem [resolvable:$true] %s22_s12  ;;  %s60_s16 = int_to_ptr.hbm [resolvable:$true] %s59_s16 }
   0x9   :  { %28 = dma.hbm_to_vmem [thread:$0]  %s21_s8, 256, %s23_s12, [#allocation3], %s580_s9, %s580_s9, %s581_s10  }
   0xa   :  { %s583_s17 = smov [#allocation7]   ;;  %s584_s19 = smov [#allocation8]  }
   0xb   :  { %s48_s18 = sshll.u32 %s583_s17, 4  ;;  %s61_s2 = sshll.u32 %s584_s19, 4  ;;  %s49_s18 = int_to_ptr.vmem [resolvable:$true] %s48_s18  ;;  %s62_s2 = int_to_ptr.vmem [resolvable:$true] %s61_s2 }
   0xc   :  { %54 = dma.hbm_to_vmem [thread:$0]  %s47_s1, 2048, %s49_s18, [#allocation6], %s580_s9, %s580_s9, %s581_s10  }
   0xd   :  { %67 = dma.hbm_to_vmem [thread:$0]  %s60_s16, 2048, %s62_s2, [#allocation9], %s580_s9, %s580_s9, %s581_s10  }
   0xe   :  { %571 = dma.done.wait [#allocation3], 256  }
   0xf   :  { %572 = vsyncadd [#allocation3], 4294967040 }
  0x10   :  { %573 = dma.done.wait [#allocation6], 2304  }
  0x11   :  { %574 = vsyncadd [#allocation6], 4294964992 }
  0x12   :  { %575 = dma.done.wait [#allocation9], 2048  }
  0x13   :  { %576 = vsyncadd [#allocation9], 4294965248  ;;  %v107_v0 = vld [vmem:[#allocation7 + $0x78] sm:$0xff]  ;;  %v106_v2 = vld [vmem:[#allocation7 + $0x70] sm:$0xff]  ;;  %s372_s26 = sshll.u32 %s698_s7, 4  ;;  %s373_s26 = int_to_ptr.hbm [resolvable:$true] %s372_s26 }
  0x14   :  { %v148_v1 = vld [vmem:[#allocation8 + $0x78] sm:$0xff]  ;;  %108 = vmatpush.msra.mxu0 %v107_v0  ;;  %v147_v3 = vld [vmem:[#allocation8 + $0x70] sm:$0xff]  ;;  %389 = vmatpush.msra.mxu2 %v107_v0  ;;  %v105_v4 = vld [vmem:[#allocation7 + $0x68] sm:$0xff] }
  0x15   :  { %149 = vmatpush.msra.mxu1 %v148_v1  ;;  %405 = vmatpush.msra.mxu3 %v148_v1  ;;  %v146_v5 = vld [vmem:[#allocation8 + $0x68] sm:$0xff]  ;;  %v104_v6 = vld [vmem:[#allocation7 + $0x60] sm:$0xff]  ;;  %v103_v8 = vld [vmem:[#allocation7 + $0x58] sm:$0xff] }
  0x16   :  { %109 = vmatpush.msra.mxu0 %v106_v2  ;;  %390 = vmatpush.msra.mxu2 %v106_v2  ;;  %v145_v7 = vld [vmem:[#allocation8 + $0x60] sm:$0xff]  ;;  %v144_v9 = vld [vmem:[#allocation8 + $0x58] sm:$0xff]  ;;  %v102_v10 = vld [vmem:[#allocation7 + $0x50] sm:$0xff] }
  0x17   :  { %150 = vmatpush.msra.mxu1 %v147_v3  ;;  %406 = vmatpush.msra.mxu3 %v147_v3  ;;  %v143_v11 = vld [vmem:[#allocation8 + $0x50] sm:$0xff]  ;;  %v101_v12 = vld [vmem:[#allocation7 + $0x48] sm:$0xff]  ;;  %v100_v14 = vld [vmem:[#allocation7 + $0x40] sm:$0xff] }
  0x18   :  { %110 = vmatpush.msra.mxu0 %v105_v4  ;;  %391 = vmatpush.msra.mxu2 %v105_v4  ;;  %v142_v13 = vld [vmem:[#allocation8 + $0x48] sm:$0xff]  ;;  %v141_v15 = vld [vmem:[#allocation8 + $0x40] sm:$0xff]  ;;  %v99_v16 = vld [vmem:[#allocation7 + $0x38] sm:$0xff] }
  0x19   :  { %151 = vmatpush.msra.mxu1 %v146_v5  ;;  %407 = vmatpush.msra.mxu3 %v146_v5  ;;  %v140_v17 = vld [vmem:[#allocation8 + $0x38] sm:$0xff]  ;;  %v98_v18 = vld [vmem:[#allocation7 + $0x30] sm:$0xff]  ;;  %v97_v20 = vld [vmem:[#allocation7 + $0x28] sm:$0xff] }
  0x1a   :  { %111 = vmatpush.msra.mxu0 %v104_v6  ;;  %392 = vmatpush.msra.mxu2 %v104_v6  ;;  %v139_v19 = vld [vmem:[#allocation8 + $0x30] sm:$0xff]  ;;  %v138_v21 = vld [vmem:[#allocation8 + $0x28] sm:$0xff]  ;;  %v96_v22 = vld [vmem:[#allocation7 + $0x20] sm:$0xff] }
  0x1b   :  { %152 = vmatpush.msra.mxu1 %v145_v7  ;;  %408 = vmatpush.msra.mxu3 %v145_v7  ;;  %v137_v23 = vld [vmem:[#allocation8 + $0x20] sm:$0xff]  ;;  %v95_v24 = vld [vmem:[#allocation7 + $0x18] sm:$0xff]  ;;  %v94_v26 = vld [vmem:[#allocation7 + $0x10] sm:$0xff] }
  0x1c   :  { %112 = vmatpush.msra.mxu0 %v103_v8  ;;  %393 = vmatpush.msra.mxu2 %v103_v8  ;;  %v136_v25 = vld [vmem:[#allocation8 + $0x18] sm:$0xff]  ;;  %v135_v27 = vld [vmem:[#allocation8 + $0x10] sm:$0xff]  ;;  %v93_v28 = vld [vmem:[#allocation7 + $0x8] sm:$0xff] }
  0x1d   :  { %153 = vmatpush.msra.mxu1 %v144_v9  ;;  %409 = vmatpush.msra.mxu3 %v144_v9  ;;  %v134_v29 = vld [vmem:[#allocation8 + $0x8] sm:$0xff]  ;;  %v92_v30 = vld [vmem:[#allocation7] sm:$0xff]  ;;  %v131_v33 = vld [vmem:[#allocation5] sm:$0xff] }
  0x1e   :  { %113 = vmatpush.msra.mxu0 %v102_v10  ;;  %394 = vmatpush.msra.mxu2 %v102_v10  ;;  %v133_v31 = vld [vmem:[#allocation8] sm:$0xff]  ;;  %v91_v34 = vld [vmem:[#allocation2 + $0x8] sm:$0xff]  ;;  %v132_v35 = vld [vmem:[#allocation5 + $0x8] sm:$0xff] }
  0x1f   :  { %154 = vmatpush.msra.mxu1 %v143_v11  ;;  %410 = vmatpush.msra.mxu3 %v143_v11  ;;  %v90_v32 = vld [vmem:[#allocation2] sm:$0xff] }
  0x20   :  { %114 = vmatpush.msra.mxu0 %v101_v12  ;;  %395 = vmatpush.msra.mxu2 %v101_v12 }
  0x21   :  { %155 = vmatpush.msra.mxu1 %v142_v13  ;;  %411 = vmatpush.msra.mxu3 %v142_v13 }
  0x22   :  { %115 = vmatpush.msra.mxu0 %v100_v14  ;;  %396 = vmatpush.msra.mxu2 %v100_v14 }
  0x23   :  { %156 = vmatpush.msra.mxu1 %v141_v15  ;;  %412 = vmatpush.msra.mxu3 %v141_v15 }
  0x24   :  { %116 = vmatpush.msra.mxu0 %v99_v16  ;;  %397 = vmatpush.msra.mxu2 %v99_v16 }
  0x25   :  { %157 = vmatpush.msra.mxu1 %v140_v17  ;;  %413 = vmatpush.msra.mxu3 %v140_v17 }
  0x26   :  { %117 = vmatpush.msra.mxu0 %v98_v18  ;;  %398 = vmatpush.msra.mxu2 %v98_v18 }
  0x27   :  { %158 = vmatpush.msra.mxu1 %v139_v19  ;;  %414 = vmatpush.msra.mxu3 %v139_v19 }
  0x28   :  { %118 = vmatpush.msra.mxu0 %v97_v20  ;;  %399 = vmatpush.msra.mxu2 %v97_v20  ;;  %v661_v20 = vld [vmem:[%s696_s5] ss:$0 sm:$0xff] }
  0x29   :  { %159 = vmatpush.msra.mxu1 %v138_v21  ;;  %415 = vmatpush.msra.mxu3 %v138_v21 }
  0x2a   :  { %119 = vmatpush.msra.mxu0 %v96_v22  ;;  %400 = vmatpush.msra.mxu2 %v96_v22 }
  0x2b   :  { %160 = vmatpush.msra.mxu1 %v137_v23  ;;  %416 = vmatpush.msra.mxu3 %v137_v23 }
  0x2c   :  { %120 = vmatpush.msra.mxu0 %v95_v24  ;;  %401 = vmatpush.msra.mxu2 %v95_v24 }
  0x2d   :  { %161 = vmatpush.msra.mxu1 %v136_v25  ;;  %417 = vmatpush.msra.mxu3 %v136_v25 }
  0x2e   :  { %121 = vmatpush.msra.mxu0 %v94_v26  ;;  %402 = vmatpush.msra.mxu2 %v94_v26  ;;  %v666_v26 = vld [vmem:[%s697_s6] ss:$0 sm:$0xff] }
  0x2f   :  { %162 = vmatpush.msra.mxu1 %v135_v27  ;;  %418 = vmatpush.msra.mxu3 %v135_v27 }
  0x30   :  { %122 = vmatpush.msra.mxu0 %v93_v28  ;;  %403 = vmatpush.msra.mxu2 %v93_v28 }
  0x31   :  { %163 = vmatpush.msra.mxu1 %v134_v29  ;;  %419 = vmatpush.msra.mxu3 %v134_v29 }
  0x32   :  { %123 = vmatpush.msra.mxu0 %v92_v30  ;;  %404 = vmatpush.msra.mxu2 %v92_v30 }
  0x33   :  { %164 = vmatpush.msra.mxu1 %v133_v31  ;;  %124 = vmatmul.f32.vlgmr.msra.gmra.mxu0 %v90_v32 }
  0x34   :  { %165 = vmatmul.f32.vlgmr.msra.gmra.mxu1 %v131_v33  ;;  %420 = vmatpush.msra.mxu3 %v133_v31 }
  0x35   :  { %127 = vmatmul.f32.vlgmr.msra.gmra.mxu2 %v91_v34  ;;  %168 = vmatmul.f32.vlgmr.msra.gmra.mxu3 %v132_v35 }
  0xb0   :  { %v125_v36 = vpop.f32.mrf.mxu0 }
  0xb1   :  { %v166_v37 = vpop.f32.mrf.mxu1  ;;  %181 = vadd.xlane.f32.xlu0 %v125_v36 }
  0xb2   :  { %225 = vadd.xlane.f32.xlu1 %v166_v37 }
  0xb8   :  { %v128_v38 = vpop.f32.mrf.mxu2  ;;  %v169_v39 = vpop.f32.mrf.mxu3 }
  0xb9   :  { %183 = vadd.xlane.f32.xlu0 %v128_v38 }
  0xba   :  { %227 = vadd.xlane.f32.xlu1 %v169_v39 }
 0x124   :  { %v182_v41 = vpop.xlane.xlu0 %181 }
 0x125   :  { %v226_v40 = vpop.xlane.xlu1 %225  ;;  %v185_v43 = vmul.f32 0.0078125, %v182_v41 }
 0x126   :  { %v229_v42 = vmul.f32 0.0078125, %v226_v40 }
 0x127   :  { %v187_v45 = vsub.f32 %v125_v36, %v185_v43 }
 0x128   :  { %v231_v44 = vsub.f32 %v166_v37, %v229_v42  ;;  %v430_v37 = vld [vmem:[%s695_s4] ss:$0 sm:$0xff]  ;;  %s585_s4 = smov [#allocation10]  }
 0x129   :  { %v189_v47 = vmul.f32 %v187_v45, %v187_v45  ;;  %s370_s23 = sshll.u32 %s585_s4, 4  ;;  %s371_s23 = int_to_ptr.vmem [resolvable:$true] %s370_s23 }
 0x12a   :  { %v233_v46 = vmul.f32 %v231_v44, %v231_v44 }
 0x12b   :  { %191 = vadd.xlane.f32.xlu2 %v189_v47 }
 0x12c   :  { %235 = vadd.xlane.f32.xlu0 %v233_v46  ;;  %v184_v49 = vpop.xlane.xlu0 %183 }
 0x12d   :  { %v228_v48 = vpop.xlane.xlu1 %227  ;;  %v186_v51 = vmul.f32 0.0078125, %v184_v49 }
 0x12e   :  { %v230_v50 = vmul.f32 0.0078125, %v228_v48 }
 0x12f   :  { %v652_v53 = vsub.f32 %v128_v38, %v186_v51 }
 0x130   :  { %v650_v52 = vsub.f32 %v169_v39, %v230_v50 }
 0x131   :  { %v190_v55 = vmul.f32 %v652_v53, %v652_v53 }
 0x132   :  { %v234_v54 = vmul.f32 %v650_v52, %v650_v52 }
 0x133   :  { %193 = vadd.xlane.f32.xlu2 %v190_v55 }
 0x134   :  { %237 = vadd.xlane.f32.xlu1 %v234_v54 }
 0x19e   :  { %v192_v56 = vpop.xlane.xlu2 %191 }
 0x19f   :  { %v236_v57 = vpop.xlane.xlu0 %235  ;;  %v195_v58 = vmul.f32 0.0078125, %v192_v56 }
 0x1a0   :  { %v239_v59 = vmul.f32 0.0078125, %v236_v57 }
 0x1a1   :  { %v197_v60 = vadd.f32 1e-05, %v195_v58 }
 0x1a2   :  { %v241_v61 = vadd.f32 1e-05, %v239_v59 }
 0x1a3   :  { %431 = vrsqrt.f32 %v197_v60  ;;  %vm205_vm2 = vweird.f32 %v197_v60 }
 0x1a4   :  { %433 = vrsqrt.f32 %v241_v61  ;;  %vm249_vm4 = vweird.f32 %v241_v61 }
 0x1a6   :  { %v194_v63 = vpop.xlane.xlu2 %193 }
 0x1a7   :  { %v238_v62 = vpop.xlane.xlu1 %237  ;;  %v196_v1 = vmul.f32 0.0078125, %v194_v63 }
 0x1a8   :  { %v240_v0 = vmul.f32 0.0078125, %v238_v62 }
 0x1a9   :  { %v432_v2 = vpop.eup %431  ;;  %v198_v4 = vadd.f32 1e-05, %v196_v1 }
 0x1aa   :  { %v242_v3 = vadd.f32 1e-05, %v240_v0  ;;  %v434_v5 = vpop.eup %433  ;;  %v200_v6 = vmul.f32 %v432_v2, %v197_v60  ;;  %vm206_vm0 = vweird.f32 %v432_v2 }
 0x1ab   :  { %v244_v7 = vmul.f32 %v434_v5, %v241_v61  ;;  %vm250_vm1 = vweird.f32 %v434_v5  ;;  %vm207_vm3 = vmor %vm205_vm2, %vm206_vm0  ;;  %vm215_vm10 = vweird.f32 %v198_v4 }
 0x1ac   :  { %435 = vrsqrt.f32 %v242_v3  ;;  %v201_v8 = vmul.f32 %v432_v2, %v200_v6  ;;  %vm251_vm5 = vmor %vm249_vm4, %vm250_vm1  ;;  %vm259_vm8 = vweird.f32 %v242_v3 }
 0x1ad   :  { %437 = vrsqrt.f32 %v198_v4  ;;  %v245_v9 = vmul.f32 %v434_v5, %v244_v7 }
 0x1ae   :  { %v202_v10 = vmul.f32 0.5, %v201_v8 }
 0x1af   :  { %v246_v11 = vmul.f32 0.5, %v245_v9 }
 0x1b0   :  { %v203_v12 = vsub.f32 1.5, %v202_v10 }
 0x1b1   :  { %v247_v14 = vsub.f32 1.5, %v246_v11 }
 0x1b2   :  { %v436_v13 = vpop.eup %435  ;;  %v204_v16 = vmul.f32 %v432_v2, %v203_v12 }
 0x1b3   :  { %v438_v15 = vpop.eup %437  ;;  %v254_v17 = vmul.f32 %v436_v13, %v242_v3  ;;  %v248_v18 = vmul.f32 %v434_v5, %v247_v14  ;;  %vm260_vm6 = vweird.f32 %v436_v13 }
 0x1b4   :  { %v210_v19 = vmul.f32 %v438_v15, %v198_v4  ;;  %v208_v21 = vsel %vm207_vm3, %v432_v2, %v204_v16  ;;  %vm216_vm7 = vweird.f32 %v438_v15  ;;  %vm261_vm9 = vmor %vm259_vm8, %vm260_vm6 }
 0x1b5   :  { %v255_v22 = vmul.f32 %v436_v13, %v254_v17  ;;  %v219_v23 = vmul.f32 %v208_v21, %v187_v45  ;;  %v252_v24 = vsel %vm251_vm5, %v434_v5, %v248_v18  ;;  %vm217_vm11 = vmor %vm215_vm10, %vm216_vm7 }
 0x1b6   :  { %v211_v25 = vmul.f32 %v438_v15, %v210_v19  ;;  %v263_v27 = vmul.f32 %v252_v24, %v231_v44 }
 0x1b7   :  { %v256_v28 = vmul.f32 0.5, %v255_v22  ;;  %v221_v30 = vmul.f32 %v661_v20, %v219_v23 }
 0x1b8   :  { %v212_v29 = vmul.f32 0.5, %v211_v25  ;;  %v265_v32 = vmul.f32 %v661_v20, %v263_v27 }
 0x1b9   :  { %v257_v31 = vsub.f32 1.5, %v256_v28  ;;  %v223_v34 = vadd.f32 %v666_v26, %v221_v30 }
 0x1ba   :  { %v213_v33 = vsub.f32 1.5, %v212_v29  ;;  %v267_v36 = vadd.f32 %v666_v26, %v265_v32 }
 0x1bb   :  { %v258_v35 = vmul.f32 %v436_v13, %v257_v31 }
 0x1bc   :  { %v214_v38 = vmul.f32 %v438_v15, %v213_v33  ;;  %v269_v40 = vadd.f32 %v267_v36, %v223_v34  ;;  %v314_v3 = vsub.f32 %v223_v34, %v267_v36 }
 0x1bd   :  { %v262_v39 = vsel %vm261_vm9, %v436_v13, %v258_v35 }
 0x1be   :  { %v264_v41 = vmul.f32 %v262_v39, %v650_v52  ;;  %v218_v42 = vsel %vm217_vm11, %v438_v15, %v214_v38  ;;  %v274_v44 = vadd.f32 %v430_v37, %v269_v40 }
 0x1bf   :  { %v220_v43 = vmul.f32 %v218_v42, %v652_v53 }
 0x1c0   :  { %v266_v45 = vmul.f32 %v661_v20, %v264_v41  ;;  %v387_v46 = vmul.f32 -1.442695, %v274_v44 }
 0x1c1   :  { %v222_v47 = vmul.f32 %v661_v20, %v220_v43 }
 0x1c2   :  { %v268_v48 = vadd.f32 %v666_v26, %v266_v45  ;;  %439 = vpow2.f32 %v387_v46 }
 0x1c3   :  { %v224_v49 = vadd.f32 %v666_v26, %v222_v47 }
 0x1c5   :  { %v270_v50 = vadd.f32 %v268_v48, %v224_v49  ;;  %v315_v15 = vsub.f32 %v224_v49, %v268_v48 }
 0x1c7   :  { %v275_v51 = vadd.f32 %v430_v37, %v270_v50 }
 0x1c8   :  { %v440_v54 = vpop.eup %439 }
 0x1c9   :  { %v388_v55 = vmul.f32 -1.442695, %v275_v51  ;;  %v282_v56 = vadd.f32 1.0, %v440_v54 }
 0x1cb   :  { %441 = vpow2.f32 %v388_v55  ;;  %v295_v60 = vand.u32 2147483648, %v282_v56  ;;  %v293_v62 = vand.u32 2147483647, %v282_v56  ;;  %vm289_vm13 = vweird.f32 %v282_v56 }
 0x1cc   :  { %443 = vrcp.f32 %v282_v56 }
 0x1cd   :  { %v296_v1 = vor.u32 1.1754944e-38, %v295_v60  ;;  %vm294_vm15 = vcmp.eq.f32.partialorder %v293_v62, 8.507059e+37 }
 0x1d1   :  { %v442_v52 = vpop.eup %441 }
 0x1d2   :  { %v444_v53 = vpop.eup %443  ;;  %v283_v57 = vadd.f32 1.0, %v442_v52 }
 0x1d3   :  { %v285_v58 = vmul.f32 %v444_v53, %v282_v56  ;;  %vm290_vm12 = vweird.f32 %v444_v53 }
 0x1d4   :  { %445 = vrcp.f32 %v283_v57  ;;  %vm291_vm14 = vmor %vm289_vm13, %vm290_vm12  ;;  %v310_v8 = vand.u32 2147483648, %v283_v57  ;;  %v308_v11 = vand.u32 2147483647, %v283_v57  ;;  %vm304_vm1 = vweird.f32 %v283_v57 }
 0x1d5   :  { %v286_v59 = vsub.f32 1.0, %v285_v58 }
 0x1d6   :  { %v311_v13 = vor.u32 1.1754944e-38, %v310_v8  ;;  %vm309_vm3 = vcmp.eq.f32.partialorder %v308_v11, 8.507059e+37 }
 0x1d7   :  { %v287_v61 = vmul.f32 %v444_v53, %v286_v59 }
 0x1d9   :  { %v288_v63 = vadd.f32 %v444_v53, %v287_v61 }
 0x1da   :  { %v446_v0 = vpop.eup %445 }
 0x1db   :  { %v292_v2 = vsel %vm291_vm14, %v444_v53, %v288_v63  ;;  %v300_v4 = vmul.f32 %v446_v0, %v283_v57  ;;  %vm305_vm0 = vweird.f32 %v446_v0 }
 0x1dc   :  { %v297_v5 = vsel %vm294_vm15, %v296_v1, %v292_v2  ;;  %vm306_vm2 = vmor %vm304_vm1, %vm305_vm0 }
 0x1dd   :  { %v316_v6 = vmul.f32 %v314_v3, %v297_v5  ;;  %v301_v7 = vsub.f32 1.0, %v300_v4 }
 0x1df   :  { %v318_v9 = vadd.f32 %v316_v6, %v267_v36  ;;  %v302_v10 = vmul.f32 %v446_v0, %v301_v7 }
 0x1e1   :  { %320 = vadd.xlane.f32.xlu2 %v318_v9  ;;  %v303_v12 = vadd.f32 %v446_v0, %v302_v10 }
 0x1e3   :  { %v307_v14 = vsel %vm306_vm2, %v446_v0, %v303_v12 }
 0x1e4   :  { %v312_v16 = vsel %vm309_vm3, %v311_v13, %v307_v14 }
 0x1e5   :  { %v317_v17 = vmul.f32 %v315_v15, %v312_v16 }
 0x1e7   :  { %v319_v18 = vadd.f32 %v317_v17, %v268_v48 }
 0x1e9   :  { %322 = vadd.xlane.f32.xlu0 %v319_v18 }
 0x254   :  { %v321_v19 = vpop.xlane.xlu2 %320 }
 0x255   :  { %v324_v21 = vmul.f32 0.0078125, %v321_v19 }
 0x257   :  { %v326_v22 = vsub.f32 %v318_v9, %v324_v21 }
 0x259   :  { %v328_v23 = vmul.f32 %v326_v22, %v326_v22 }
 0x25b   :  { %330 = vadd.xlane.f32.xlu1 %v328_v23 }
 0x25c   :  { %v323_v24 = vpop.xlane.xlu0 %322 }
 0x25d   :  { %v325_v25 = vmul.f32 0.0078125, %v323_v24 }
 0x25f   :  { %v327_v27 = vsub.f32 %v319_v18, %v325_v25 }
 0x261   :  { %v329_v28 = vmul.f32 %v327_v27, %v327_v27 }
 0x263   :  { %332 = vadd.xlane.f32.xlu2 %v329_v28 }
 0x2ce   :  { %v331_v29 = vpop.xlane.xlu1 %330 }
 0x2cf   :  { %v334_v30 = vmul.f32 0.0078125, %v331_v29 }
 0x2d1   :  { %v336_v31 = vadd.f32 1e-05, %v334_v30 }
 0x2d3   :  { %447 = vrsqrt.f32 %v336_v31  ;;  %vm344_vm5 = vweird.f32 %v336_v31 }
 0x2d6   :  { %v333_v32 = vpop.xlane.xlu2 %332 }
 0x2d7   :  { %v335_v33 = vmul.f32 0.0078125, %v333_v32 }
 0x2d9   :  { %v448_v34 = vpop.eup %447  ;;  %v337_v35 = vadd.f32 1e-05, %v335_v33 }
 0x2da   :  { %v339_v36 = vmul.f32 %v448_v34, %v336_v31  ;;  %vm345_vm4 = vweird.f32 %v448_v34 }
 0x2db   :  { %449 = vrsqrt.f32 %v337_v35  ;;  %vm346_vm6 = vmor %vm344_vm5, %vm345_vm4  ;;  %vm354_vm8 = vweird.f32 %v337_v35 }
 0x2dc   :  { %v340_v37 = vmul.f32 %v448_v34, %v339_v36 }
 0x2de   :  { %v341_v38 = vmul.f32 0.5, %v340_v37 }
 0x2e0   :  { %v342_v39 = vsub.f32 1.5, %v341_v38 }
 0x2e1   :  { %v450_v40 = vpop.eup %449 }
 0x2e2   :  { %v343_v41 = vmul.f32 %v448_v34, %v342_v39  ;;  %v349_v42 = vmul.f32 %v450_v40, %v337_v35  ;;  %vm355_vm7 = vweird.f32 %v450_v40 }
 0x2e3   :  { %vm356_vm9 = vmor %vm354_vm8, %vm355_vm7 }
 0x2e4   :  { %v347_v43 = vsel %vm346_vm6, %v448_v34, %v343_v41  ;;  %v350_v44 = vmul.f32 %v450_v40, %v349_v42 }
 0x2e5   :  { %v358_v45 = vmul.f32 %v347_v43, %v326_v22 }
 0x2e6   :  { %v351_v46 = vmul.f32 0.5, %v350_v44 }
 0x2e7   :  { %v360_v47 = vmul.f32 %v661_v20, %v358_v45 }
 0x2e8   :  { %v352_v48 = vsub.f32 1.5, %v351_v46 }
 0x2e9   :  { %v362_v49 = vadd.f32 %v666_v26, %v360_v47 }
 0x2ea   :  { %v353_v50 = vmul.f32 %v450_v40, %v352_v48 }
 0x2eb   :  { %364 = vst [vmem:[#allocation10] sm:$0xff] %v362_v49 }
 0x2ec   :  { %v357_v51 = vsel %vm356_vm9, %v450_v40, %v353_v50 }
 0x2ed   :  { %v359_v54 = vmul.f32 %v357_v51, %v327_v27 }
 0x2ef   :  { %v361_v55 = vmul.f32 %v661_v20, %v359_v54 }
 0x2f1   :  { %v363_v56 = vadd.f32 %v666_v26, %v361_v55 }
 0x2f3   :  { %365 = vst [vmem:[#allocation10 + $0x8] sm:$0xff] %v363_v56 }
 0x2f4   :  { %378 = dma.vmem_to_hbm [thread:$0]  %s371_s23, 256, %s373_s26, [#allocation4], %s580_s9, %s580_s9, %s581_s10  }
 0x2f5   :  { %577 = dma.done.wait [#allocation4], 256  }
 0x2f6   :  { %578 = vsyncadd [#allocation4], 4294967040 }
 0x2f7   :  { %383 = vsyncpa [#allocation3], 1 }
 0x2f8   :  { %384 = vsyncpa [#allocation6], 1 }
 0x2f9   :  { %385 = vsyncpa [#allocation9], 1 }
 0x2fa   :  { %386 = vsyncpa [#allocation4], 1 }

// kernel: tpu_custom_call.1
= control target key start
LH: loop header
LB: loop body
LE: loop exit
PB: predicated region body
PF: predicated region fallthrough
CT: control target
= control target key end

     0   :  { %12 = vsyncpa [#allocation3], 0  ;;  %s691_s0 = inlined_call_operand.hbm [shape: f32[16,128], index: 0, kind: input, shape index: {}]   ;;  %s692_s1 = inlined_call_operand.hbm [shape: f32[16,128], index: 1, kind: input, shape index: {}]   ;;  %s693_s2 = inlined_call_operand.hbm [shape: f32[128,128], index: 2, kind: input, shape index: {}]   ;;  %s694_s3 = inlined_call_operand.hbm [shape: f32[128,128], index: 3, kind: input, shape index: {}]   ;;  %s695_s4 = inlined_call_operand.vmem [shape: f32[1,128], index: 4, kind: input, shape index: {}]   ;;  %s696_s5 = inlined_call_operand.vmem [shape: f32[1,128], index: 5, kind: input, shape index: {}]   ;;  %s697_s6 = inlined_call_operand.vmem [shape: f32[1,128], index: 6, kind: input, shape index: {}]   ;;  %s698_s7 = inlined_call_operand.hbm [shape: f32[16,128], index: 7, kind: output, shape index: {}]  }
   0x1   :  { %13 = vsyncpa [#allocation6], 0 }
   0x2   :  { %14 = vsyncpa [#allocation9], 0 }
   0x3   :  { %15 = vsyncpa [#allocation4], 0  ;;  %s33_s26 = sshll.u32 %s692_s1, 4  ;;  %s579_s27 = smov [#allocation5]   ;;  %s34_s26 = int_to_ptr.hbm [resolvable:$true] %s33_s26 }
   0x4   :  { %s35_s28 = sshll.u32 %s579_s27, 4  ;;  %s20_s8 = sshll.u32 %s691_s0, 4  ;;  %s36_s28 = int_to_ptr.vmem [resolvable:$true] %s35_s28  ;;  %s21_s8 = int_to_ptr.hbm [resolvable:$true] %s20_s8 }
   0x5   :  { %s580_s9 = smov 128   ;;  %s581_s10 = smov 8  }
   0x6   :  { %41 = dma.hbm_to_vmem [thread:$0]  %s34_s26, 256, %s36_s28, [#allocation6], %s580_s9, %s580_s9, %s581_s10  }
   0x7   :  { %s582_s11 = smov [#allocation2]   ;;  %s46_s1 = sshll.u32 %s693_s2, 4  ;;  %s47_s1 = int_to_ptr.hbm [resolvable:$true] %s46_s1 }
   0x8   :  { %s22_s12 = sshll.u32 %s582_s11, 4  ;;  %s59_s16 = sshll.u32 %s694_s3, 4  ;;  %s23_s12 = int_to_ptr.vmem [resolvable:$true] %s22_s12  ;;  %s60_s16 = int_to_ptr.hbm [resolvable:$true] %s59_s16 }
   0x9   :  { %28 = dma.hbm_to_vmem [thread:$0]  %s21_s8, 256, %s23_s12, [#allocation3], %s580_s9, %s580_s9, %s581_s10  }
   0xa   :  { %s583_s17 = smov [#allocation7]   ;;  %s584_s19 = smov [#allocation8]  }
   0xb   :  { %s48_s18 = sshll.u32 %s583_s17, 4  ;;  %s61_s2 = sshll.u32 %s584_s19, 4  ;;  %s49_s18 = int_to_ptr.vmem [resolvable:$true] %s48_s18  ;;  %s62_s2 = int_to_ptr.vmem [resolvable:$true] %s61_s2 }
   0xc   :  { %54 = dma.hbm_to_vmem [thread:$0]  %s47_s1, 2048, %s49_s18, [#allocation6], %s580_s9, %s580_s9, %s581_s10  }
   0xd   :  { %67 = dma.hbm_to_vmem [thread:$0]  %s60_s16, 2048, %s62_s2, [#allocation9], %s580_s9, %s580_s9, %s581_s10  }
   0xe   :  { %571 = dma.done.wait [#allocation3], 256  }
   0xf   :  { %572 = vsyncadd [#allocation3], 4294967040 }
  0x10   :  { %573 = dma.done.wait [#allocation6], 2304  }
  0x11   :  { %574 = vsyncadd [#allocation6], 4294964992 }
  0x12   :  { %575 = dma.done.wait [#allocation9], 2048  }
  0x13   :  { %576 = vsyncadd [#allocation9], 4294965248  ;;  %v107_v0 = vld [vmem:[#allocation7 + $0x78] sm:$0xff]  ;;  %v106_v2 = vld [vmem:[#allocation7 + $0x70] sm:$0xff]  ;;  %s372_s26 = sshll.u32 %s698_s7, 4  ;;  %s373_s26 = int_to_ptr.hbm [resolvable:$true] %s372_s26 }
  0x14   :  { %v148_v1 = vld [vmem:[#allocation8 + $0x78] sm:$0xff]  ;;  %108 = vmatpush.msra.mxu0 %v107_v0  ;;  %v147_v3 = vld [vmem:[#allocation8 + $0x70] sm:$0xff]  ;;  %389 = vmatpush.msra.mxu2 %v107_v0  ;;  %v105_v4 = vld [vmem:[#allocation7 + $0x68] sm:$0xff] }
  0x15   :  { %149 = vmatpush.msra.mxu1 %v148_v1  ;;  %405 = vmatpush.msra.mxu3 %v148_v1  ;;  %v146_v5 = vld [vmem:[#allocation8 + $0x68] sm:$0xff]  ;;  %v104_v6 = vld [vmem:[#allocation7 + $0x60] sm:$0xff]  ;;  %v103_v8 = vld [vmem:[#allocation7 + $0x58] sm:$0xff] }
  0x16   :  { %109 = vmatpush.msra.mxu0 %v106_v2  ;;  %390 = vmatpush.msra.mxu2 %v106_v2  ;;  %v145_v7 = vld [vmem:[#allocation8 + $0x60] sm:$0xff]  ;;  %v144_v9 = vld [vmem:[#allocation8 + $0x58] sm:$0xff]  ;;  %v102_v10 = vld [vmem:[#allocation7 + $0x50] sm:$0xff] }
  0x17   :  { %150 = vmatpush.msra.mxu1 %v147_v3  ;;  %406 = vmatpush.msra.mxu3 %v147_v3  ;;  %v143_v11 = vld [vmem:[#allocation8 + $0x50] sm:$0xff]  ;;  %v101_v12 = vld [vmem:[#allocation7 + $0x48] sm:$0xff]  ;;  %v100_v14 = vld [vmem:[#allocation7 + $0x40] sm:$0xff] }
  0x18   :  { %110 = vmatpush.msra.mxu0 %v105_v4  ;;  %391 = vmatpush.msra.mxu2 %v105_v4  ;;  %v142_v13 = vld [vmem:[#allocation8 + $0x48] sm:$0xff]  ;;  %v141_v15 = vld [vmem:[#allocation8 + $0x40] sm:$0xff]  ;;  %v99_v16 = vld [vmem:[#allocation7 + $0x38] sm:$0xff] }
  0x19   :  { %151 = vmatpush.msra.mxu1 %v146_v5  ;;  %407 = vmatpush.msra.mxu3 %v146_v5  ;;  %v140_v17 = vld [vmem:[#allocation8 + $0x38] sm:$0xff]  ;;  %v98_v18 = vld [vmem:[#allocation7 + $0x30] sm:$0xff]  ;;  %v97_v20 = vld [vmem:[#allocation7 + $0x28] sm:$0xff] }
  0x1a   :  { %111 = vmatpush.msra.mxu0 %v104_v6  ;;  %392 = vmatpush.msra.mxu2 %v104_v6  ;;  %v139_v19 = vld [vmem:[#allocation8 + $0x30] sm:$0xff]  ;;  %v138_v21 = vld [vmem:[#allocation8 + $0x28] sm:$0xff]  ;;  %v96_v22 = vld [vmem:[#allocation7 + $0x20] sm:$0xff] }
  0x1b   :  { %152 = vmatpush.msra.mxu1 %v145_v7  ;;  %408 = vmatpush.msra.mxu3 %v145_v7  ;;  %v137_v23 = vld [vmem:[#allocation8 + $0x20] sm:$0xff]  ;;  %v95_v24 = vld [vmem:[#allocation7 + $0x18] sm:$0xff]  ;;  %v94_v26 = vld [vmem:[#allocation7 + $0x10] sm:$0xff] }
  0x1c   :  { %112 = vmatpush.msra.mxu0 %v103_v8  ;;  %393 = vmatpush.msra.mxu2 %v103_v8  ;;  %v136_v25 = vld [vmem:[#allocation8 + $0x18] sm:$0xff]  ;;  %v135_v27 = vld [vmem:[#allocation8 + $0x10] sm:$0xff]  ;;  %v93_v28 = vld [vmem:[#allocation7 + $0x8] sm:$0xff] }
  0x1d   :  { %153 = vmatpush.msra.mxu1 %v144_v9  ;;  %409 = vmatpush.msra.mxu3 %v144_v9  ;;  %v134_v29 = vld [vmem:[#allocation8 + $0x8] sm:$0xff]  ;;  %v92_v30 = vld [vmem:[#allocation7] sm:$0xff]  ;;  %v131_v33 = vld [vmem:[#allocation5] sm:$0xff] }
  0x1e   :  { %113 = vmatpush.msra.mxu0 %v102_v10  ;;  %394 = vmatpush.msra.mxu2 %v102_v10  ;;  %v133_v31 = vld [vmem:[#allocation8] sm:$0xff]  ;;  %v91_v34 = vld [vmem:[#allocation2 + $0x8] sm:$0xff]  ;;  %v132_v35 = vld [vmem:[#allocation5 + $0x8] sm:$0xff] }
  0x1f   :  { %154 = vmatpush.msra.mxu1 %v143_v11  ;;  %410 = vmatpush.msra.mxu3 %v143_v11  ;;  %v90_v32 = vld [vmem:[#allocation2] sm:$0xff] }
  0x20   :  { %114 = vmatpush.msra.mxu0 %v101_v12  ;;  %395 = vmatpush.msra.mxu2 %v101_v12 }
  0x21   :  { %155 = vmatpush.msra.mxu1 %v142_v13  ;;  %411 = vmatpush.msra.mxu3 %v142_v13 }
  0x22   :  { %115 = vmatpush.msra.mxu0 %v100_v14  ;;  %396 = vmatpush.msra.mxu2 %v100_v14 }
  0x23   :  { %156 = vmatpush.msra.mxu1 %v141_v15  ;;  %412 = vmatpush.msra.mxu3 %v141_v15 }
  0x24   :  { %116 = vmatpush.msra.mxu0 %v99_v16  ;;  %397 = vmatpush.msra.mxu2 %v99_v16 }
  0x25   :  { %157 = vmatpush.msra.mxu1 %v140_v17  ;;  %413 = vmatpush.msra.mxu3 %v140_v17 }
  0x26   :  { %117 = vmatpush.msra.mxu0 %v98_v18  ;;  %398 = vmatpush.msra.mxu2 %v98_v18 }
  0x27   :  { %158 = vmatpush.msra.mxu1 %v139_v19  ;;  %414 = vmatpush.msra.mxu3 %v139_v19 }
  0x28   :  { %118 = vmatpush.msra.mxu0 %v97_v20  ;;  %399 = vmatpush.msra.mxu2 %v97_v20  ;;  %v661_v20 = vld [vmem:[%s696_s5] ss:$0 sm:$0xff] }
  0x29   :  { %159 = vmatpush.msra.mxu1 %v138_v21  ;;  %415 = vmatpush.msra.mxu3 %v138_v21 }
  0x2a   :  { %119 = vmatpush.msra.mxu0 %v96_v22  ;;  %400 = vmatpush.msra.mxu2 %v96_v22 }
  0x2b   :  { %160 = vmatpush.msra.mxu1 %v137_v23  ;;  %416 = vmatpush.msra.mxu3 %v137_v23 }
  0x2c   :  { %120 = vmatpush.msra.mxu0 %v95_v24  ;;  %401 = vmatpush.msra.mxu2 %v95_v24 }
  0x2d   :  { %161 = vmatpush.msra.mxu1 %v136_v25  ;;  %417 = vmatpush.msra.mxu3 %v136_v25 }
  0x2e   :  { %121 = vmatpush.msra.mxu0 %v94_v26  ;;  %402 = vmatpush.msra.mxu2 %v94_v26  ;;  %v666_v26 = vld [vmem:[%s697_s6] ss:$0 sm:$0xff] }
  0x2f   :  { %162 = vmatpush.msra.mxu1 %v135_v27  ;;  %418 = vmatpush.msra.mxu3 %v135_v27 }
  0x30   :  { %122 = vmatpush.msra.mxu0 %v93_v28  ;;  %403 = vmatpush.msra.mxu2 %v93_v28 }
  0x31   :  { %163 = vmatpush.msra.mxu1 %v134_v29  ;;  %419 = vmatpush.msra.mxu3 %v134_v29 }
  0x32   :  { %123 = vmatpush.msra.mxu0 %v92_v30  ;;  %404 = vmatpush.msra.mxu2 %v92_v30 }
  0x33   :  { %164 = vmatpush.msra.mxu1 %v133_v31  ;;  %124 = vmatmul.f32.vlgmr.msra.gmra.mxu0 %v90_v32 }
  0x34   :  { %165 = vmatmul.f32.vlgmr.msra.gmra.mxu1 %v131_v33  ;;  %420 = vmatpush.msra.mxu3 %v133_v31 }
  0x35   :  { %127 = vmatmul.f32.vlgmr.msra.gmra.mxu2 %v91_v34  ;;  %168 = vmatmul.f32.vlgmr.msra.gmra.mxu3 %v132_v35 }
  0xb0   :  { %v125_v36 = vpop.f32.mrf.mxu0 }
  0xb1   :  { %v166_v37 = vpop.f32.mrf.mxu1  ;;  %181 = vadd.xlane.f32.xlu0 %v125_v36 }
  0xb2   :  { %225 = vadd.xlane.f32.xlu1 %v166_v37 }
  0xb8   :  { %v128_v38 = vpop.f32.mrf.mxu2  ;;  %v169_v39 = vpop.f32.mrf.mxu3 }
  0xb9   :  { %183 = vadd.xlane.f32.xlu0 %v128_v38 }
  0xba   :  { %227 = vadd.xlane.f32.xlu1 %v169_v39 }
 0x124   :  { %v182_v41 = vpop.xlane.xlu0 %181 }
 0x125   :  { %v226_v40 = vpop.xlane.xlu1 %225  ;;  %v185_v43 = vmul.f32 0.0078125, %v182_v41 }
 0x126   :  { %v229_v42 = vmul.f32 0.0078125, %v226_v40 }
 0x127   :  { %v187_v45 = vsub.f32 %v125_v36, %v185_v43 }
 0x128   :  { %v231_v44 = vsub.f32 %v166_v37, %v229_v42  ;;  %v430_v37 = vld [vmem:[%s695_s4] ss:$0 sm:$0xff]  ;;  %s585_s4 = smov [#allocation10]  }
 0x129   :  { %v189_v47 = vmul.f32 %v187_v45, %v187_v45  ;;  %s370_s23 = sshll.u32 %s585_s4, 4  ;;  %s371_s23 = int_to_ptr.vmem [resolvable:$true] %s370_s23 }
 0x12a   :  { %v233_v46 = vmul.f32 %v231_v44, %v231_v44 }
 0x12b   :  { %191 = vadd.xlane.f32.xlu2 %v189_v47 }
 0x12c   :  { %235 = vadd.xlane.f32.xlu0 %v233_v46  ;;  %v184_v49 = vpop.xlane.xlu0 %183 }
 0x12d   :  { %v228_v48 = vpop.xlane.xlu1 %227  ;;  %v186_v51 = vmul.f32 0.0078125, %v184_v49 }
 0x12e   :  { %v230_v50 = vmul.f32 0.0078125, %v228_v48 }
 0x12f   :  { %v652_v53 = vsub.f32 %v128_v38, %v186_v51 }
 0x130   :  { %v650_v52 = vsub.f32 %v169_v39, %v230_v50 }
 0x131   :  { %v190_v55 = vmul.f32 %v652_v53, %v652_v53 }
 0x132   :  { %v234_v54 = vmul.f32 %v650_v52, %v650_v52 }
 0x133   :  { %193 = vadd.xlane.f32.xlu2 %v190_v55 }
 0x134   :  { %237 = vadd.xlane.f32.xlu1 %v234_v54 }
 0x19e   :  { %v192_v56 = vpop.xlane.xlu2 %191 }
 0x19f   :  { %v236_v57 = vpop.xlane.xlu0 %235  ;;  %v195_v58 = vmul.f32 0.0078125, %v192_v56 }
 0x1a0   :  { %v239_v59 = vmul.f32 0.0078125, %v236_v57 }
 0x1a1   :  { %v197_v60 = vadd.f32 1e-05, %v195_v58 }
 0x1a2   :  { %v241_v61 = vadd.f32 1e-05, %v239_v59 }
 0x1a3   :  { %431 = vrsqrt.f32 %v197_v60  ;;  %vm205_vm2 = vweird.f32 %v197_v60 }
 0x1a4   :  { %433 = vrsqrt.f32 %v241_v61  ;;  %vm249_vm4 = vweird.f32 %v241_v61 }
 0x1a6   :  { %v194_v63 = vpop.xlane.xlu2 %193 }
 0x1a7   :  { %v238_v62 = vpop.xlane.xlu1 %237  ;;  %v196_v1 = vmul.f32 0.0078125, %v194_v63 }
 0x1a8   :  { %v240_v0 = vmul.f32 0.0078125, %v238_v62 }
 0x1a9   :  { %v432_v2 = vpop.eup %431  ;;  %v198_v4 = vadd.f32 1e-05, %v196_v1 }
 0x1aa   :  { %v242_v3 = vadd.f32 1e-05, %v240_v0  ;;  %v434_v5 = vpop.eup %433  ;;  %v200_v6 = vmul.f32 %v432_v2, %v197_v60  ;;  %vm206_vm0 = vweird.f32 %v432_v2 }
 0x1ab   :  { %v244_v7 = vmul.f32 %v434_v5, %v241_v61  ;;  %vm250_vm1 = vweird.f32 %v434_v5  ;;  %vm207_vm3 = vmor %vm205_vm2, %vm206_vm0  ;;  %vm215_vm10 = vweird.f32 %v198_v4 }
 0x1ac   :  { %435 = vrsqrt.f32 %v242_v3  ;;  %v201_v8 = vmul.f32 %v432_v2, %v200_v6  ;;  %vm251_vm5 = vmor %vm249_vm4, %vm250_vm1  ;;  %vm259_vm8 = vweird.f32 %v242_v3 }
 0x1ad   :  { %437 = vrsqrt.f32 %v198_v4  ;;  %v245_v9 = vmul.f32 %v434_v5, %v244_v7 }
 0x1ae   :  { %v202_v10 = vmul.f32 0.5, %v201_v8 }
 0x1af   :  { %v246_v11 = vmul.f32 0.5, %v245_v9 }
 0x1b0   :  { %v203_v12 = vsub.f32 1.5, %v202_v10 }
 0x1b1   :  { %v247_v14 = vsub.f32 1.5, %v246_v11 }
 0x1b2   :  { %v436_v13 = vpop.eup %435  ;;  %v204_v16 = vmul.f32 %v432_v2, %v203_v12 }
 0x1b3   :  { %v438_v15 = vpop.eup %437  ;;  %v254_v17 = vmul.f32 %v436_v13, %v242_v3  ;;  %v248_v18 = vmul.f32 %v434_v5, %v247_v14  ;;  %vm260_vm6 = vweird.f32 %v436_v13 }
 0x1b4   :  { %v210_v19 = vmul.f32 %v438_v15, %v198_v4  ;;  %v208_v21 = vsel %vm207_vm3, %v432_v2, %v204_v16  ;;  %vm216_vm7 = vweird.f32 %v438_v15  ;;  %vm261_vm9 = vmor %vm259_vm8, %vm260_vm6 }
 0x1b5   :  { %v255_v22 = vmul.f32 %v436_v13, %v254_v17  ;;  %v219_v23 = vmul.f32 %v208_v21, %v187_v45  ;;  %v252_v24 = vsel %vm251_vm5, %v434_v5, %v248_v18  ;;  %vm217_vm11 = vmor %vm215_vm10, %vm216_vm7 }
 0x1b6   :  { %v211_v25 = vmul.f32 %v438_v15, %v210_v19  ;;  %v263_v27 = vmul.f32 %v252_v24, %v231_v44 }
 0x1b7   :  { %v256_v28 = vmul.f32 0.5, %v255_v22  ;;  %v221_v30 = vmul.f32 %v661_v20, %v219_v23 }
 0x1b8   :  { %v212_v29 = vmul.f32 0.5, %v211_v25  ;;  %v265_v32 = vmul.f32 %v661_v20, %v263_v27 }
 0x1b9   :  { %v257_v31 = vsub.f32 1.5, %v256_v28  ;;  %v223_v34 = vadd.f32 %v666_v26, %v221_v30 }
 0x1ba   :  { %v213_v33 = vsub.f32 1.5, %v212_v29  ;;  %v267_v36 = vadd.f32 %v666_v26, %v265_v32 }
 0x1bb   :  { %v258_v35 = vmul.f32 %v436_v13, %v257_v31 }
 0x1bc   :  { %v214_v38 = vmul.f32 %v438_v15, %v213_v33  ;;  %v269_v40 = vadd.f32 %v267_v36, %v223_v34  ;;  %v314_v3 = vsub.f32 %v223_v34, %v267_v36 }
 0x1bd   :  { %v262_v39 = vsel %vm261_vm9, %v436_v13, %v258_v35 }
 0x1be   :  { %v264_v41 = vmul.f32 %v262_v39, %v650_v52  ;;  %v218_v42 = vsel %vm217_vm11, %v438_v15, %v214_v38  ;;  %v274_v44 = vadd.f32 %v430_v37, %v269_v40 }
 0x1bf   :  { %v220_v43 = vmul.f32 %v218_v42, %v652_v53 }
 0x1c0   :  { %v266_v45 = vmul.f32 %v661_v20, %v264_v41  ;;  %v387_v46 = vmul.f32 -1.442695, %v274_v44 }
 0x1c1   :  { %v222_v47 = vmul.f32 %v661_v20, %v220_v43 }
 0x1c2   :  { %v268_v48 = vadd.f32 %v666_v26, %v266_v45  ;;  %439 = vpow2.f32 %v387_v46 }
 0x1c3   :  { %v224_v49 = vadd.f32 %v666_v26, %v222_v47 }
 0x1c5   :  { %v270_v50 = vadd.f32 %v268_v48, %v224_v49  ;;  %v315_v15 = vsub.f32 %v224_v49, %v268_v48 }
 0x1c7   :  { %v275_v51 = vadd.f32 %v430_v37, %v270_v50 }
 0x1c8   :  { %v440_v54 = vpop.eup %439 }
 0x1c9   :  { %v388_v55 = vmul.f32 -1.442695, %v275_v51  ;;  %v282_v56 = vadd.f32 1.0, %v440_v54 }
 0x1cb   :  { %441 = vpow2.f32 %v388_v55  ;;  %v295_v60 = vand.u32 2147483648, %v282_v56  ;;  %v293_v62 = vand.u32 2147483647, %v282_v56  ;;  %vm289_vm13 = vweird.f32 %v282_v56 }
 0x1cc   :  { %443 = vrcp.f32 %v282_v56 }
 0x1cd   :  { %v296_v1 = vor.u32 1.1754944e-38, %v295_v60  ;;  %vm294_vm15 = vcmp.eq.f32.partialorder %v293_v62, 8.507059e+37 }
 0x1d1   :  { %v442_v52 = vpop.eup %441 }
 0x1d2   :  { %v444_v53 = vpop.eup %443  ;;  %v283_v57 = vadd.f32 1.0, %v442_v52 }
 0x1d3   :  { %v285_v58 = vmul.f32 %v444_v53, %v282_v56  ;;  %vm290_vm12 = vweird.f32 %v444_v53 }
 0x1d4   :  { %445 = vrcp.f32 %v283_v57  ;;  %vm291_vm14 = vmor %vm289_vm13, %vm290_vm12  ;;  %v310_v8 = vand.u32 2147483648, %v283_v57  ;;  %v308_v11 = vand.u32 2147483647, %v283_v57  ;;  %vm304_vm1 = vweird.f32 %v283_v57 }
 0x1d5   :  { %v286_v59 = vsub.f32 1.0, %v285_v58 }
 0x1d6   :  { %v311_v13 = vor.u32 1.1754944e-38, %v310_v8  ;;  %vm309_vm3 = vcmp.eq.f32.partialorder %v308_v11, 8.507059e+37 }
 0x1d7   :  { %v287_v61 = vmul.f32 %v444_v53, %v286_v59 }
 0x1d9   :  { %v288_v63 = vadd.f32 %v444_v53, %v287_v61 }
 0x1da   :  { %v446_v0 = vpop.eup %445 }
 0x1db   :  { %v292_v2 = vsel %vm291_vm14, %v444_v53, %v288_v63  ;;  %v300_v4 = vmul.f32 %v446_v0, %v283_v57  ;;  %vm305_vm0 = vweird.f32 %v446_v0 }
 0x1dc   :  { %v297_v5 = vsel %vm294_vm15, %v296_v1, %v292_v2  ;;  %vm306_vm2 = vmor %vm304_vm1, %vm305_vm0 }
 0x1dd   :  { %v316_v6 = vmul.f32 %v314_v3, %v297_v5  ;;  %v301_v7 = vsub.f32 1.0, %v300_v4 }
 0x1df   :  { %v318_v9 = vadd.f32 %v316_v6, %v267_v36  ;;  %v302_v10 = vmul.f32 %v446_v0, %v301_v7 }
 0x1e1   :  { %320 = vadd.xlane.f32.xlu2 %v318_v9  ;;  %v303_v12 = vadd.f32 %v446_v0, %v302_v10 }
 0x1e3   :  { %v307_v14 = vsel %vm306_vm2, %v446_v0, %v303_v12 }
 0x1e4   :  { %v312_v16 = vsel %vm309_vm3, %v311_v13, %v307_v14 }
 0x1e5   :  { %v317_v17 = vmul.f32 %v315_v15, %v312_v16 }
 0x1e7   :  { %v319_v18 = vadd.f32 %v317_v17, %v268_v48 }
 0x1e9   :  { %322 = vadd.xlane.f32.xlu0 %v319_v18 }
 0x254   :  { %v321_v19 = vpop.xlane.xlu2 %320 }
 0x255   :  { %v324_v21 = vmul.f32 0.0078125, %v321_v19 }
 0x257   :  { %v326_v22 = vsub.f32 %v318_v9, %v324_v21 }
 0x259   :  { %v328_v23 = vmul.f32 %v326_v22, %v326_v22 }
 0x25b   :  { %330 = vadd.xlane.f32.xlu1 %v328_v23 }
 0x25c   :  { %v323_v24 = vpop.xlane.xlu0 %322 }
 0x25d   :  { %v325_v25 = vmul.f32 0.0078125, %v323_v24 }
 0x25f   :  { %v327_v27 = vsub.f32 %v319_v18, %v325_v25 }
 0x261   :  { %v329_v28 = vmul.f32 %v327_v27, %v327_v27 }
 0x263   :  { %332 = vadd.xlane.f32.xlu2 %v329_v28 }
 0x2ce   :  { %v331_v29 = vpop.xlane.xlu1 %330 }
 0x2cf   :  { %v334_v30 = vmul.f32 0.0078125, %v331_v29 }
 0x2d1   :  { %v336_v31 = vadd.f32 1e-05, %v334_v30 }
 0x2d3   :  { %447 = vrsqrt.f32 %v336_v31  ;;  %vm344_vm5 = vweird.f32 %v336_v31 }
 0x2d6   :  { %v333_v32 = vpop.xlane.xlu2 %332 }
 0x2d7   :  { %v335_v33 = vmul.f32 0.0078125, %v333_v32 }
 0x2d9   :  { %v448_v34 = vpop.eup %447  ;;  %v337_v35 = vadd.f32 1e-05, %v335_v33 }
 0x2da   :  { %v339_v36 = vmul.f32 %v448_v34, %v336_v31  ;;  %vm345_vm4 = vweird.f32 %v448_v34 }
 0x2db   :  { %449 = vrsqrt.f32 %v337_v35  ;;  %vm346_vm6 = vmor %vm344_vm5, %vm345_vm4  ;;  %vm354_vm8 = vweird.f32 %v337_v35 }
 0x2dc   :  { %v340_v37 = vmul.f32 %v448_v34, %v339_v36 }
 0x2de   :  { %v341_v38 = vmul.f32 0.5, %v340_v37 }
 0x2e0   :  { %v342_v39 = vsub.f32 1.5, %v341_v38 }
 0x2e1   :  { %v450_v40 = vpop.eup %449 }
 0x2e2   :  { %v343_v41 = vmul.f32 %v448_v34, %v342_v39  ;;  %v349_v42 = vmul.f32 %v450_v40, %v337_v35  ;;  %vm355_vm7 = vweird.f32 %v450_v40 }
 0x2e3   :  { %vm356_vm9 = vmor %vm354_vm8, %vm355_vm7 }
 0x2e4   :  { %v347_v43 = vsel %vm346_vm6, %v448_v34, %v343_v41  ;;  %v350_v44 = vmul.f32 %v450_v40, %v349_v42 }
 0x2e5   :  { %v358_v45 = vmul.f32 %v347_v43, %v326_v22 }
 0x2e6   :  { %v351_v46 = vmul.f32 0.5, %v350_v44 }
 0x2e7   :  { %v360_v47 = vmul.f32 %v661_v20, %v358_v45 }
 0x2e8   :  { %v352_v48 = vsub.f32 1.5, %v351_v46 }
 0x2e9   :  { %v362_v49 = vadd.f32 %v666_v26, %v360_v47 }
 0x2ea   :  { %v353_v50 = vmul.f32 %v450_v40, %v352_v48 }
 0x2eb   :  { %364 = vst [vmem:[#allocation10] sm:$0xff] %v362_v49 }
 0x2ec   :  { %v357_v51 = vsel %vm356_vm9, %v450_v40, %v353_v50 }
 0x2ed   :  { %v359_v54 = vmul.f32 %v357_v51, %v327_v27 }
 0x2ef   :  { %v361_v55 = vmul.f32 %v661_v20, %v359_v54 }
 0x2f1   :  { %v363_v56 = vadd.f32 %v666_v26, %v361_v55 }
 0x2f3   :  { %365 = vst [vmem:[#allocation10 + $0x8] sm:$0xff] %v363_v56 }
 0x2f4   :  { %378 = dma.vmem_to_hbm [thread:$0]  %s371_s23, 256, %s373_s26, [#allocation4], %s580_s9, %s580_s9, %s581_s10  }
 0x2f5   :  { %577 = dma.done.wait [#allocation4], 256  }
 0x2f6   :  { %578 = vsyncadd [#allocation4], 4294967040 }
 0x2f7   :  { %383 = vsyncpa [#allocation3], 1 }
 0x2f8   :  { %384 = vsyncpa [#allocation6], 1 }
 0x2f9   :  { %385 = vsyncpa [#allocation9], 1 }
 0x2fa   :  { %386 = vsyncpa [#allocation4], 1 }

</bundles_post_ra>
